<compile_context>
chip_gen: v6e
topology: v6e:2x2x1
jax: 0.10.0
libtpu: 0.0.40
codegen_flags: <defaults>
</compile_context>

<pallas_src>
import functools

import jax
import jax.numpy as jnp
from jax.experimental import pallas as pl
from jax.experimental.pallas import tpu as pltpu


_BLOCK_BYTES_CAP = 4 * 1024 * 1024   # per x-block cap; 4 live buffers stay <= 16 MiB


# ------------------------------- Pallas kernel ------------------------------ #

def _scse_kernel(x_ref, pm_ref, out_ref, *, r_rows, hd, inv_p):
    """One block of `r_rows = Nb*C` (batch, channel) rows, full spatial extent.

    x_ref  : (R, P)   input rows (row r -> batch b(r) = r//C, channel c(r) = r%C)
    pm_ref : (R, K)   packed params:
                      [ Bsum (R) | W1row (Hd) | W2row (Hd) | b1 (Hd) | b2 | wsse | bsse ]
                      Bsum[r, r'] = 1 iff rows r, r' belong to the same batch.
                      W1row[r, :] = W1[:, c(r)],  W2row[r, :] = W2[c(r), :], etc.
    out_ref: (R, P)
    """
    pm = pm_ref[...]                                            # (R, K) f32
    o = 0
    bsum = pm[:, o:o + r_rows]; o += r_rows                     # (R, R)
    w1r = pm[:, o:o + hd]; o += hd                              # (R, Hd)
    w2r = pm[:, o:o + hd]; o += hd                              # (R, Hd)
    b1r = pm[:, o:o + hd]; o += hd                              # (R, Hd) (b1 in every row)
    b2r = pm[:, o:o + 1]; o += 1                                # (R, 1)
    wsser = pm[:, o:o + 1]; o += 1                              # (R, 1)
    bsser = pm[:, o:o + 1]                                      # (R, 1)

    x = x_ref[...].astype(jnp.float32)                          # (R, P) upcast in VMEM

    # ---- cSE: AdaptiveAvgPool2d(1) -> Linear -> ReLU -> Linear -> Sigmoid ----
    pooled = jnp.sum(x, axis=1, keepdims=True) * inv_p          # (R, 1) lane reduce
    # h[r, j] = relu( sum_{c'} W1[j, c'] * pooled[b(r), c'] + b1[j] )
    h = jnp.dot(bsum, w1r * pooled,
                preferred_element_type=jnp.float32) + b1r       # (R, Hd)
    h = jnp.maximum(h, 0.0)
    # g[r] = sigmoid( sum_j W2[c(r), j] * h[b(r), j] + b2[c(r)] )
    g = jax.nn.sigmoid(jnp.sum(w2r * h, axis=1, keepdims=True) + b2r)   # (R, 1)

    # ---- sSE: Conv2d(C, 1, 1) -> Sigmoid ----
    # s[r, p] = sigmoid( sum_{c'} wsse[c'] * x[b(r), c', p] + bsse )
    s = jax.nn.sigmoid(jnp.dot(bsum, wsser * x,
                               preferred_element_type=jnp.float32) + bsser)  # (R, P)

    # ---- combine: x*g + x*s ----
    out_ref[...] = (x * (g + s)).astype(out_ref.dtype)


# --------------------------------- wrapper ---------------------------------- #

def _pick_batches_per_block(n, c, p, itemsize, cap_bytes=_BLOCK_BYTES_CAP):
    """Largest Nb dividing N with block bytes <= cap, preferring sublane-full rows."""
    fallback = 1
    for nb in range(n, 0, -1):
        if n % nb:
            continue
        if nb * c * p * itemsize > cap_bytes:
            continue
        rows = nb * c
        if nb == n or rows % 8 == 0:      # full array, or sublane-aligned tiling
            return nb
        fallback = max(fallback, nb)
    return fallback


@jax.jit
def scse_forward(x_nchw, params):
    """Pallas implementation of SCSE.forward.  x_nchw: (N, C, H, W) like PyTorch."""
    N, C, H, W = x_nchw.shape
    P = H * W
    Hd = params["w1"].shape[0]
    dtype = x_nchw.dtype

    Nb = _pick_batches_per_block(N, C, P, jnp.dtype(dtype).itemsize)
    R = Nb * C
    n_blocks = N // Nb
    PK = R + 3 * Hd + 3

    # ---- static row -> (batch-in-block, channel) maps ----
    c_idx = jnp.tile(jnp.arange(C), Nb)                          # (R,)
    b_idx = jnp.repeat(jnp.arange(Nb), C)                        # (R,)

    w1 = params["w1"].astype(jnp.float32)                        # (Hd, C)
    b1 = params["b1"].astype(jnp.float32)                        # (Hd,)
    w2 = params["w2"].astype(jnp.float32)                        # (C, Hd)
    b2 = params["b2"].astype(jnp.float32)                        # (C,)
    wsse = params["wsse"].reshape(C).astype(jnp.float32)         # (C,)
    bsse = params["bsse"].reshape(1, 1).astype(jnp.float32)      # (1, 1)

    # ---- pack everything into one (R, PK) slab: one DMA, one padded VMEM tile ----
    bsum = (b_idx[:, None] == b_idx[None, :]).astype(jnp.float32)        # (R, R)
    w1row = w1.T[c_idx]                                                  # (R, Hd)
    w2row = w2[c_idx]                                                    # (R, Hd)
    b1row = jnp.broadcast_to(b1.reshape(1, Hd), (R, Hd))                 # (R, Hd)
    b2row = b2[c_idx].reshape(R, 1)                                      # (R, 1)
    wsserow = wsse[c_idx].reshape(R, 1)                                  # (R, 1)
    bsserow = jnp.broadcast_to(bsse, (R, 1))                             # (R, 1)
    param_slab = jnp.concatenate(
        [bsum, w1row, w2row, b1row, b2row, wsserow, bsserow], axis=1)    # (R, PK)

    # Lane/sublane-dense activation slab; free for contiguous NCHW.
    x2d = x_nchw.reshape(N * C, P)

    kernel = functools.partial(_scse_kernel, r_rows=R, hd=Hd, inv_p=1.0 / P)

    out2d = pl.pallas_call(
        kernel,
        out_shape=jax.ShapeDtypeStruct((N * C, P), dtype),
        grid=(n_blocks,),
        in_specs=[
            pl.BlockSpec((R, P), lambda i: (i, 0)),              # x: Nb batches / step
            pl.BlockSpec((R, PK), lambda i: (0, 0)),             # packed params (resident)
        ],
        out_specs=pl.BlockSpec((R, P), lambda i: (i, 0)),
        input_output_aliases={0: 0},                             # out reuses x's buffer
        compiler_params=pltpu.CompilerParams(
            dimension_semantics=("parallel",),                   # batch blocks independent
            vmem_limit_bytes=48 * 1024 * 1024),
    )(x2d, param_slab)

    return out2d.reshape(N, C, H, W)


# ----------------------------- pure-JAX reference ---------------------------- #

def _ref_scse(x, params):
    pooled = jnp.mean(x, axis=(2, 3))                                        # (N, C)
    h = jnp.maximum(pooled @ params["w1"].T + params["b1"], 0.0)             # (N, Hd)
    g = jax.nn.sigmoid(h @ params["w2"].T + params["b2"])                    # (N, C)
    s = jax.nn.sigmoid(
        jnp.einsum("nchw,c->nhw", x, params["wsse"]) + params["bsse"])       # (N, H, W)
    return x * g[:, :, None, None] + x * s[:, None, :, :]


# ----------------------------------- main ------------------------------------ #

if __name__ == "__main__":
    N, C, H, W = 2, 4, 16, 16
    r = 2.0 / 3.0
    Hd = int(C * r)                      # int(4 * 2/3) = 2, matching the PyTorch module

    keys = jax.random.split(jax.random.PRNGKey(0), 8)
    nrm = jax.random.normal
    params = dict(
        w1=0.5 * nrm(keys[0], (Hd, C), jnp.float32),   # Linear(in_ch, Hd).weight
        b1=0.1 * nrm(keys[1], (Hd,), jnp.float32),
        w2=0.5 * nrm(keys[2], (C, Hd), jnp.float32),   # Linear(Hd, in_ch).weight
        b2=0.1 * nrm(keys[3], (C,), jnp.float32),
        wsse=0.5 * nrm(keys[4], (C,), jnp.float32),    # Conv2d(in_ch, 1, 1).weight squeezed
        bsse=0.1 * nrm(keys[5], (1,), jnp.float32),
    )
    x = nrm(keys[6], (N, C, H, W), jnp.float32)        # NCHW like PyTorch

    ref = _ref_scse(x, params)                         # reference first (x never donated)

    out = jax.block_until_ready(scse_forward(x, params))
    assert out.shape == (N, C, H, W), out.shape
    assert out.dtype == x.dtype, out.dtype

    max_err = float(jnp.max(jnp.abs(out - ref)))
    assert max_err < 1e-4, f"max abs error vs reference too large: {max_err}"

    print("KERNEL_OK")
</pallas_src>

<mosaic_0001>
module attributes {stable_mosaic.version = 11 : i64} {
  func.func @_scse_kernel(%arg0: i32, %arg1: memref<8x256xf32, #tpu.memory_space<vmem>>, %arg2: memref<8x17xf32, #tpu.memory_space<vmem>>, %arg3: memref<8x256xf32, #tpu.memory_space<vmem>>) attributes {dimension_semantics = [#tpu.dimension_semantics<parallel>], iteration_bounds = array<i64: 1>, scalar_prefetch = 0 : i64, scratch_operands = 0 : i64, tpu.core_type = #tpu.core_type<tc>, window_params = [{transform_indices = @transform_0, window_bounds = array<i64: 8, 256>}, {pipeline_mode = #tpu.pipeline_mode<synchronous>, transform_indices = @transform_1, window_bounds = array<i64: 8, 17>}, {transform_indices = @transform_2, window_bounds = array<i64: 8, 256>}]} {
    %c0 = arith.constant 0 : index
    %c0_0 = arith.constant 0 : index
    %0 = vector.load %arg2[%c0, %c0_0] : memref<8x17xf32, #tpu.memory_space<vmem>>, vector<8x17xf32>
    %1 = vector.extract_strided_slice %0 {offsets = [0, 0], sizes = [8, 8], strides = [1, 1]} : vector<8x17xf32> to vector<8x8xf32>
    %2 = vector.extract_strided_slice %0 {offsets = [0, 8], sizes = [8, 2], strides = [1, 1]} : vector<8x17xf32> to vector<8x2xf32>
    %3 = vector.extract_strided_slice %0 {offsets = [0, 10], sizes = [8, 2], strides = [1, 1]} : vector<8x17xf32> to vector<8x2xf32>
    %4 = vector.extract_strided_slice %0 {offsets = [0, 12], sizes = [8, 2], strides = [1, 1]} : vector<8x17xf32> to vector<8x2xf32>
    %5 = vector.extract_strided_slice %0 {offsets = [0, 14], sizes = [8, 1], strides = [1, 1]} : vector<8x17xf32> to vector<8x1xf32>
    %6 = vector.extract_strided_slice %0 {offsets = [0, 15], sizes = [8, 1], strides = [1, 1]} : vector<8x17xf32> to vector<8x1xf32>
    %7 = vector.extract_strided_slice %0 {offsets = [0, 16], sizes = [8, 1], strides = [1, 1]} : vector<8x17xf32> to vector<8x1xf32>
    %c0_1 = arith.constant 0 : index
    %c0_2 = arith.constant 0 : index
    %8 = vector.load %arg1[%c0_1, %c0_2] : memref<8x256xf32, #tpu.memory_space<vmem>>, vector<8x256xf32>
    %cst = arith.constant dense<0.000000e+00> : vector<8xf32>
    %9 = vector.multi_reduction <add>, %8, %cst [1] : vector<8x256xf32> to vector<8xf32>
    %10 = vector.shape_cast %9 : vector<8xf32> to vector<8x1xf32>
    %cst_3 = arith.constant 3.906250e-03 : f32
    %11 = vector.broadcast %cst_3 : f32 to vector<8x1xf32>
    %12 = arith.mulf %10, %11 : vector<8x1xf32>
    %13 = vector.broadcast %12 : vector<8x1xf32> to vector<8x2xf32>
    %14 = arith.mulf %2, %13 : vector<8x2xf32>
    %cst_4 = arith.constant dense<0.000000e+00> : vector<8x2xf32>
    %15 = tpu.matmul %1, %14, %cst_4 {dimension_numbers = #tpu.dot_dimension_numbers<[1], [0], [0], [1], [0, 0, 1, 1], [], []>} : vector<8x8xf32>, vector<8x2xf32>, vector<8x2xf32> -> vector<8x2xf32>
    %16 = arith.addf %15, %4 : vector<8x2xf32>
    %cst_5 = arith.constant 0.000000e+00 : f32
    %17 = vector.broadcast %cst_5 : f32 to vector<8x2xf32>
    %18 = arith.maximumf %16, %17 : vector<8x2xf32>
    %19 = arith.mulf %3, %18 : vector<8x2xf32>
    %cst_6 = arith.constant dense<0.000000e+00> : vector<8xf32>
    %20 = vector.multi_reduction <add>, %19, %cst_6 [1] : vector<8x2xf32> to vector<8xf32>
    %21 = vector.shape_cast %20 : vector<8xf32> to vector<8x1xf32>
    %22 = arith.addf %21, %5 : vector<8x1xf32>
    %23 = arith.negf %22 : vector<8x1xf32>
    %24 = math.exp %23 : vector<8x1xf32>
    %cst_7 = arith.constant 1.000000e+00 : f32
    %25 = vector.broadcast %cst_7 : f32 to vector<8x1xf32>
    %26 = arith.addf %25, %24 : vector<8x1xf32>
    %27 = arith.divf %25, %26 : vector<8x1xf32>
    %28 = vector.broadcast %6 : vector<8x1xf32> to vector<8x256xf32>
    %29 = arith.mulf %28, %8 : vector<8x256xf32>
    %cst_8 = arith.constant dense<0.000000e+00> : vector<8x256xf32>
    %30 = tpu.matmul %1, %29, %cst_8 {dimension_numbers = #tpu.dot_dimension_numbers<[1], [0], [0], [1], [0, 0, 1, 1], [], []>} : vector<8x8xf32>, vector<8x256xf32>, vector<8x256xf32> -> vector<8x256xf32>
    %31 = vector.broadcast %7 : vector<8x1xf32> to vector<8x256xf32>
    %32 = arith.addf %30, %31 : vector<8x256xf32>
    %33 = arith.negf %32 : vector<8x256xf32>
    %34 = math.exp %33 : vector<8x256xf32>
    %cst_9 = arith.constant 1.000000e+00 : f32
    %35 = vector.broadcast %cst_9 : f32 to vector<8x256xf32>
    %36 = arith.addf %35, %34 : vector<8x256xf32>
    %37 = arith.divf %35, %36 : vector<8x256xf32>
    %38 = vector.broadcast %27 : vector<8x1xf32> to vector<8x256xf32>
    %39 = arith.addf %38, %37 : vector<8x256xf32>
    %40 = arith.mulf %8, %39 : vector<8x256xf32>
    %c0_10 = arith.constant 0 : index
    %c0_11 = arith.constant 0 : index
    %41 = vector.load %arg3[%c0_10, %c0_11] : memref<8x256xf32, #tpu.memory_space<vmem>>, vector<8x256xf32>
    tpu.vector_store %arg3[%c0_10, %c0_11], %40 {strides = array<i32>} : memref<8x256xf32, #tpu.memory_space<vmem>>, vector<8x256xf32>,
    return
  }
  func.func @transform_0(%arg0: i32) -> (i32, i32) {
    %c0_i32 = arith.constant 0 : i32
    %c0_i32_0 = arith.constant 0 : i32
    return %arg0, %c0_i32 : i32, i32
  }
  func.func @transform_1(%arg0: i32) -> (i32, i32) {
    %c0_i32 = arith.constant 0 : i32
    %c0_i32_0 = arith.constant 0 : i32
    %c0_i32_1 = arith.constant 0 : i32
    return %c0_i32, %c0_i32_0 : i32, i32
  }
  func.func @transform_2(%arg0: i32) -> (i32, i32) {
    %c0_i32 = arith.constant 0 : i32
    %c0_i32_0 = arith.constant 0 : i32
    return %arg0, %c0_i32 : i32, i32
  }
}

</mosaic_0001>

<bundles_post_ra>
// kernel: eq.8
= control target key start
LH: loop header
LB: loop body
LE: loop exit
PB: predicated region body
PF: predicated region fallthrough
CT: control target
= control target key end

     0   :  { %vm8_vm0 = vcmask 31744   ;;  %vm14_vm1 = vcmask 64544   ;;  %s42_s0 = inlined_call_operand.vmem [shape: s32[2,4], index: 0, kind: input, shape index: {}]   ;;  %s43_s1 = inlined_call_operand.vmem [shape: s32[8], index: 1, kind: output, shape index: {}]  }
   0x1   :  { %v5_v0 = vld [vmem:[%s42_s0] sm:$0x3]  ;;  %s25_s0 = smov 4  }
   0x2   :  { %6 = vst [vmem:[#allocation1] sm:$0x3] %v5_v0 }
   0x9   :  { %v11_v1 = vld [vmem:[#allocation1 + $0x1] sm:$0x1]   ;;  %v7_v2 = vld [vmem:[#allocation1] sm:$0x1]  }
   0xa   :  { %12 = vrot.lane.b32.xlu0 %v11_v1, %s25_s0  ;;  %9 = vst.msk [vmem:[#allocation0] sm:$0x1] %vm8_vm0, %v7_v2  }
  0x7c   :  { %v13_v3 = vpop.permute.xlu0 %12  }
  0x7d   :  { %15 = vst.msk [vmem:[#allocation0] sm:$0x1] %vm14_vm1, %v13_v3  }
  0x84   :  { %v20_v4 = vld [vmem:[#allocation0] sm:$0x1] }
  0x85   :  { %23 = vst [vmem:[%s43_s1] sm:$0x1] %v20_v4 }

// kernel: scse_forward.1
= control target key start
LH: loop header
LB: loop body
LE: loop exit
PB: predicated region body
PF: predicated region fallthrough
CT: control target
= control target key end

     0   :  { %v265_v3 = vmov 0.0   ;;  %vm266_vm0 = vmmov 0   ;;  %s267_s15 = smov 116   ;;  %v268_v5 = vmov 15   ;;  %vm27_vm1 = vcmask 64512   ;;  %s272_s16 = smov 118   ;;  %s314_s0 = inlined_call_operand.vmem [shape: f32[8,256], index: 0, kind: input, shape index: {}, may-alias: {0,2}]   ;;  %s315_s1 = inlined_call_operand.vmem [shape: f32[8,17], index: 1, kind: input, shape index: {}]   ;;  %s316_s2 = inlined_call_operand.vmem [shape: f32[8,256], index: 2, kind: output, shape index: {}, may-alias: {0,2}]  }
   0x1   :  { %v292_v0 = vld [vmem:[%s314_s0] sm:$0xff]  ;;  %v297_v1 = vld [vmem:[%s314_s0 + $0x8] sm:$0xff]  ;;  %236 = vmatprep.subr.mxu0 %v265_v3  ;;  %195 = vmatprep.mubr.f32.mxu1 %v265_v3  ;;  %s269_s0 = smov 120   ;;  %v271_v18 = vmov 16   ;;  %vm110_vm2 = vcmask 15360   ;;  %v273_v23 = vmov 14  }
   0x2   :  { %v14_v2 = vadd.f32 %v297_v1, %v292_v0  ;;  %238 = vmatprep.mubr.msk.f32.mxu0 %vm266_vm0, %v265_v3  ;;  %v11_v4 = vld [vmem:[%s315_s1] sm:$0xff]  ;;  %250 = vset.pattern.permute.xlu1 %v268_v5  ;;  %s270_s1 = smov 10  }
   0x3   :  { %24 = vrot.lane.b32.xlu1 %v11_v4, %s267_s15  ;;  %251 = vset.pattern.permute.xlu0 %v271_v18 }
   0x4   :  { %15 = vadd.xlane.f32.xlu0 %v14_v2 }
   0x7   :  { %122 = vperm.xlu1 %250, %v11_v4  }
  0x75   :  { %v25_v10 = vpop.permute.xlu1 %24 }
  0x82   :  { %v123_v11 = vpop.permute.xlu1 %122 }
  0x83   :  { %v126_v12 = vmul.f32 %v123_v11, %v297_v1  ;;  %v125_v13 = vmul.f32 %v123_v11, %v292_v0 }
  0x85   :  { %161 = vmatprep.subr.mxu1 %v126_v12 }
  0x86   :  { %162 = vmatpush1.msra.mxu1 %v125_v13 }
  0x87   :  { %231 = vmatmul.mubr.msk.f32.vlgmr.msra.gmra.mxu1 %vm27_vm1, %v11_v4 }
  0x8d   :  { %v16_v6 = vpop.xlane.xlu0 %15 }
  0x8e   :  { %v17_v7 = vmul.f32 0.00390625, %v16_v6 }
  0x90   :  { %v18_v8 = vmul.f32 %v17_v7, %v11_v4 }
  0x92   :  { %20 = vrot.lane.b32.xlu0 %v18_v8, %s269_s0 }
  0x96   :  { %128 = vperm.xlu0 %251, %v11_v4  }
  0x9a   :  { %252 = vset.pattern.permute.xlu0 %v273_v23 }
 0x104   :  { %v21_v9 = vpop.permute.xlu0 %20 }
 0x105   :  { %237 = vmatpush3.msra.mxu0 %v21_v9 }
 0x106   :  { %239 = vmatmul.mubr.msk.f32.vlgmr.msra.gmra.mxu0 %vm27_vm1, %v11_v4 }
 0x111   :  { %v129_v31 = vpop.permute.xlu0 %128 }
 0x147   :  { %v197_v30 = vpop.f32.mrf.mxu1 }
 0x148   :  { %v198_v33 = vadd.f32 %v197_v30, %v129_v31 }
 0x149   :  { %v199_v32 = vpop.f32.mrf.mxu1 }
 0x14a   :  { %v200_v34 = vadd.f32 %v199_v32, %v129_v31  ;;  %v232_v35 = vmul.f32 -1.442695, %v198_v33 }
 0x14c   :  { %v233_v36 = vmul.f32 -1.442695, %v200_v34 }
 0x1c6   :  { %v96_v14 = vpop.f32.mrf.mxu0 }
 0x1c7   :  { %v97_v15 = vadd.f32 %v96_v14, %v25_v10 }
 0x1c8   :  { %v240_v16 = vpop.f32.mrf.mxu0 }
 0x1c9   :  { %v100_v17 = vmax.f32 %v97_v15, 0.0 }
 0x1cb   :  { %102 = vrot.lane.b32.xlu1 %v100_v17, %s270_s1 }
 0x23d   :  { %v103_v19 = vpop.permute.xlu1 %102 }
 0x23e   :  { %v105_v20 = vmul.f32 %v103_v19, %v11_v4 }
 0x240   :  { %107 = vrot.lane.b32.xlu1 %v105_v20, %s272_s16 }
 0x2b2   :  { %v108_v21 = vpop.permute.xlu1 %107 }
 0x2b3   :  { %v111_v22 = vsel %vm110_vm2, %v108_v21, 0.0 }
 0x2b4   :  { %112 = vadd.xlane.f32.xlu1 %v111_v22 }
 0x33d   :  { %v113_v24 = vpop.xlane.xlu1 %112 }
 0x33e   :  { %v114_v25 = vadd.f32 %v113_v24, %v11_v4 }
 0x340   :  { %v230_v26 = vmul.f32 -1.442695, %v114_v25 }
 0x342   :  { %253 = vpow2.f32 %v230_v26 }
 0x34f   :  { %v254_v27 = vpop.eup %253 }
 0x350   :  { %v118_v28 = vadd.f32 1.0, %v254_v27 }
 0x352   :  { %255 = vrcp.f32 %v118_v28 }
 0x353   :  { %257 = vpow2.f32 %v232_v35 }
 0x354   :  { %259 = vpow2.f32 %v233_v36 }
 0x35f   :  { %v256_v29 = vpop.eup %255 }
 0x360   :  { %216 = vperm.xlu0 %252, %v256_v29   ;;  %v258_v37 = vpop.eup %257 }
 0x361   :  { %v260_v38 = vpop.eup %259  ;;  %v208_v39 = vadd.f32 1.0, %v258_v37 }
 0x362   :  { %v209_v40 = vadd.f32 1.0, %v260_v38 }
 0x363   :  { %261 = vrcp.f32 %v208_v39 }
 0x364   :  { %263 = vrcp.f32 %v209_v40 }
 0x370   :  { %v262_v41 = vpop.eup %261 }
 0x371   :  { %v264_v42 = vpop.eup %263 }
 0x3db   :  { %v217_v43 = vpop.permute.xlu0 %216 }
 0x3dc   :  { %v219_v44 = vadd.f32 %v262_v41, %v217_v43  ;;  %v220_v45 = vadd.f32 %v264_v42, %v217_v43 }
 0x3de   :  { %v221_v46 = vmul.f32 %v219_v44, %v292_v0  ;;  %v222_v47 = vmul.f32 %v220_v45, %v297_v1 }
 0x3e0   :  { %223 = vst [vmem:[%s316_s2] sm:$0xff] %v221_v46  ;;  %224 = vst [vmem:[%s316_s2 + $0x8] sm:$0xff] %v222_v47 }

</bundles_post_ra>
